<compile_context>
chip_gen: v7x
topology: tpu7x:2x2x1
jax: 0.10.0
libtpu: 0.0.40
codegen_flags: <defaults>
</compile_context>

<pallas_src>
import math

import jax
import jax.numpy as jnp
from jax.experimental import pallas as pl
from jax.experimental.pallas import tpu as pltpu

IN_CHANNELS = 3
OUT_CHANNELS = 16
KERNEL_SIZE = 3
POOL = 2
SUBTRACT_VALUE = 0.5


def _fused_kernel(p_ref, w_ref, b_ref, o_ref):
    # p_ref: (1, K, 4*B*Sp) bf16  phase-major im2col patches (lane order: phase, batch, spatial)
    # w_ref: (Cout, K)      bf16  flattened conv weight
    # b_ref: (Cout, 1)      f32   bias with subtract_value already folded in
    # o_ref: (1, Cout, B*Sp) bf16 fused activations for this batch chunk
    S = o_ref.shape[2]  # B * Hp * Wp

    # Conv for all 4 pooling phases and B batch elements in one MXU matmul (f32 accum).
    y = jnp.dot(w_ref[...], p_ref[0], preferred_element_type=jnp.float32)  # (Cout, 4*S)
    y = y + b_ref[...]                                                     # bias - 0.5

    # HardSwish (must run BEFORE the pool - it is not monotonic): x * relu6(x+3) / 6
    y = y * jnp.clip(y + 3.0, 0.0, 6.0) * (1.0 / 6.0)

    # 2x2 MaxPool == elementwise max over the 4 contiguous phase slices.
    pooled = jnp.maximum(jnp.maximum(y[:, 0:S], y[:, S:2 * S]),
                         jnp.maximum(y[:, 2 * S:3 * S], y[:, 3 * S:4 * S]))

    # Mish with one transcendental: tanh(softplus(x)) = ((1+e^x)^2 - 1)/((1+e^x)^2 + 1).
    # Clamp at 20 (tanh(softplus(20)) == 1 in f32) so exp never produces inf/inf.
    xc = jnp.minimum(pooled, 20.0)
    t = 1.0 + jnp.exp(xc)
    t = t * t
    mish = pooled * (t - 1.0) * pl.reciprocal(t + 1.0, approx=True)
    o_ref[0] = mish.astype(o_ref.dtype)


def _pick_batch_chunk(N, Sp, K):
    """Batch elements per grid step: ~2 MiB patch tile, B*Sp % 128 == 0 if possible, G >= 2."""
    bytes_per_b = 2 * K * POOL * POOL * Sp            # bf16 patch bytes per batch element
    b_mem = max(1, (2 << 20) // bytes_per_b)          # ~2 MiB patch tile per grid step
    b = min(b_mem, max(1, N // 2))                    # keep G >= 2 so v7x uses both TCs
    align = 128 // math.gcd(Sp, 128)                  # makes B*Sp a multiple of 128
    if b >= align:
        b = (b // align) * align
    return max(1, min(b, N))


def _run_chunk(x_c, w2, b2, B):
    """Run the fused kernel on a batch chunk whose size is divisible by B."""
    Nc, Cin, H, W = x_c.shape
    Cout, K = w2.shape
    KH = KW = KERNEL_SIZE
    Ho, Wo = H - KH + 1, W - KW + 1                   # VALID conv, stride 1
    Hp, Wp = Ho // POOL, Wo // POOL                   # MaxPool2d floor mode
    Sp = Hp * Wp
    assert Nc % B == 0
    G = Nc // B

    # --- single-pass phase-major im2col (one bf16 materialization; slices fuse into the stack)
    # axis-1 order: (tap k = ci,kh,kw) major, (pool phase ph,pw) minor  -> reshape to (K, 4*B*Sp)
    cols = []
    for ci in range(Cin):
        for kh in range(KH):
            for kw in range(KW):
                tap = x_c[:, ci, kh:kh + Ho, kw:kw + Wo]                 # (Nc, Ho, Wo)
                for ph in range(POOL):
                    for pw in range(POOL):
                        s = tap[:, ph:Hp * POOL:POOL, pw:Wp * POOL:POOL]  # (Nc, Hp, Wp)
                        cols.append(s.reshape(G, B, Sp))
    patches = jnp.stack(cols, axis=1).astype(jnp.bfloat16)               # (G, K*4, B, Sp)
    LB = POOL * POOL * B * Sp
    patches = patches.reshape(G, K, LB)                                  # (G, K, 4*B*Sp)

    S = B * Sp
    out_raw = pl.pallas_call(
        _fused_kernel,
        out_shape=jax.ShapeDtypeStruct((G, Cout, S), jnp.bfloat16),
        grid_spec=pltpu.PrefetchScalarGridSpec(
            num_scalar_prefetch=0,
            grid=(G,),
            in_specs=[
                pl.BlockSpec((1, K, LB), lambda g: (g, 0, 0)),
                pl.BlockSpec((Cout, K), lambda g: (0, 0)),
                pl.BlockSpec((Cout, 1), lambda g: (0, 0)),
            ],
            out_specs=pl.BlockSpec((1, Cout, S), lambda g: (g, 0, 0)),
        ),
        compiler_params=pltpu.CompilerParams(
            dimension_semantics=("parallel",),      # batch-chunk axis -> both v7x TCs
            vmem_limit_bytes=32 * 1024 * 1024,      # tiles are a few MiB; fits v5e/v6e/v7x
        ),
    )(patches, w2, b2)

    # (G, Cout, B*Sp) bf16 -> (Nc, Cout, Hp, Wp) f32; the cast fuses into this tiny transpose.
    out = out_raw.reshape(G, Cout, B, Hp, Wp)
    out = jnp.transpose(out, (0, 2, 1, 3, 4)).reshape(Nc, Cout, Hp, Wp)
    return out.astype(jnp.float32)


def model_forward(x_nchw, w_oihw, bias):
    N, Cin, H, W = x_nchw.shape
    Cout, _, KH, KW = w_oihw.shape
    Ho, Wo = H - KH + 1, W - KW + 1
    Hp, Wp = Ho // POOL, Wo // POOL
    Sp = Hp * Wp
    K = Cin * KH * KW

    w2 = w_oihw.reshape(Cout, K).astype(jnp.bfloat16)                    # (Cout, K) bf16
    b2 = (bias.astype(jnp.float32) - SUBTRACT_VALUE).reshape(Cout, 1)    # fold subtract

    B = _pick_batch_chunk(N, Sp, K)
    n_main = (N // B) * B

    parts = []
    if n_main > 0:
        parts.append(_run_chunk(x_nchw[:n_main], w2, b2, B))
    if N - n_main > 0:
        # remainder chunk: one extra small grid step instead of zero-padding a full chunk
        parts.append(_run_chunk(x_nchw[n_main:], w2, b2, N - n_main))
    return parts[0] if len(parts) == 1 else jnp.concatenate(parts, axis=0)


def ref_forward(x, w, b):
    """Pure-JAX f32 reference matching the PyTorch module."""
    y = jax.lax.conv_general_dilated(
        x, w, window_strides=(1, 1), padding="VALID",
        dimension_numbers=("NCHW", "OIHW", "NCHW"))
    y = y + b[None, :, None, None]
    y = y - SUBTRACT_VALUE
    y = y * jnp.clip(y + 3.0, 0.0, 6.0) / 6.0
    N, C, Ho, Wo = y.shape
    Hp, Wp = Ho // POOL, Wo // POOL
    y = y[:, :, :Hp * POOL, :Wp * POOL].reshape(N, C, Hp, POOL, Wp, POOL)
    y = y.max(axis=(3, 5))
    return y * jnp.tanh(jnp.log1p(jnp.exp(y)))


if __name__ == "__main__":
    key = jax.random.PRNGKey(0)
    kx, kw, kb = jax.random.split(key, 3)

    N, H, W = 2, 16, 16
    x = jax.random.normal(kx, (N, IN_CHANNELS, H, W), jnp.float32)

    # deterministic Conv2d-style init (uniform in +/- 1/sqrt(fan_in))
    fan_in = IN_CHANNELS * KERNEL_SIZE * KERNEL_SIZE
    bound = 1.0 / (fan_in ** 0.5)
    w = jax.random.uniform(
        kw, (OUT_CHANNELS, IN_CHANNELS, KERNEL_SIZE, KERNEL_SIZE),
        jnp.float32, -bound, bound)
    b = jax.random.uniform(kb, (OUT_CHANNELS,), jnp.float32, -bound, bound)

    out = jax.jit(model_forward)(x, w, b)
    out = jax.block_until_ready(out)

    ref = ref_forward(x, w, b)
    assert out.shape == ref.shape, (out.shape, ref.shape)
    # bf16 MXU operands + bf16 kernel output introduce ~1e-2 worst-case abs error vs the
    # full-f32 reference; accumulation and all elementwise math remain f32.
    max_err = float(jnp.max(jnp.abs(out - ref)))
    assert jnp.allclose(out, ref, atol=2.5e-2, rtol=2.5e-2), f"max abs err {max_err}"

    print("KERNEL_OK")
</pallas_src>

<mosaic_0001>
module attributes {stable_mosaic.version = 11 : i64} {
  func.func @_fused_kernel(%arg0: i32, %arg1: memref<1x27x196xbf16, #tpu.memory_space<vmem>>, %arg2: memref<16x27xbf16, #tpu.memory_space<vmem>>, %arg3: memref<16x1xf32, #tpu.memory_space<vmem>>, %arg4: memref<1x16x49xbf16, #tpu.memory_space<vmem>>) attributes {dimension_semantics = [#tpu.dimension_semantics<parallel>], iteration_bounds = array<i64: 2>, scalar_prefetch = 0 : i64, scratch_operands = 0 : i64, tpu.core_type = #tpu.core_type<tc>, window_params = [{transform_indices = @transform_0, window_bounds = array<i64: 1, 27, 196>}, {pipeline_mode = #tpu.pipeline_mode<synchronous>, transform_indices = @transform_1, window_bounds = array<i64: 16, 27>}, {pipeline_mode = #tpu.pipeline_mode<synchronous>, transform_indices = @transform_2, window_bounds = array<i64: 16, 1>}, {transform_indices = @transform_3, window_bounds = array<i64: 1, 16, 49>}]} {
    %c0 = arith.constant 0 : index
    %c0_0 = arith.constant 0 : index
    %0 = vector.load %arg2[%c0, %c0_0] : memref<16x27xbf16, #tpu.memory_space<vmem>>, vector<16x27xbf16>
    %c0_1 = arith.constant 0 : index
    %c0_2 = arith.constant 0 : index
    %c0_3 = arith.constant 0 : index
    %1 = vector.load %arg1[%c0_1, %c0_2, %c0_3] : memref<1x27x196xbf16, #tpu.memory_space<vmem>>, vector<1x27x196xbf16>
    %2 = vector.shape_cast %1 : vector<1x27x196xbf16> to vector<27x196xbf16>
    %cst = arith.constant dense<0.000000e+00> : vector<16x196xf32>
    %3 = tpu.matmul %0, %2, %cst {dimension_numbers = #tpu.dot_dimension_numbers<[1], [0], [0], [1], [0, 0, 1, 1], [], []>} : vector<16x27xbf16>, vector<27x196xbf16>, vector<16x196xf32> -> vector<16x196xf32>
    %c0_4 = arith.constant 0 : index
    %c0_5 = arith.constant 0 : index
    %4 = vector.load %arg3[%c0_4, %c0_5] : memref<16x1xf32, #tpu.memory_space<vmem>>, vector<16x1xf32>
    %5 = vector.broadcast %4 : vector<16x1xf32> to vector<16x196xf32>
    %6 = arith.addf %3, %5 : vector<16x196xf32>
    %cst_6 = arith.constant 3.000000e+00 : f32
    %7 = vector.broadcast %cst_6 : f32 to vector<16x196xf32>
    %8 = arith.addf %6, %7 : vector<16x196xf32>
    %cst_7 = arith.constant 0.000000e+00 : f32
    %cst_8 = arith.constant 6.000000e+00 : f32
    %9 = vector.broadcast %cst_7 : f32 to vector<16x196xf32>
    %10 = arith.maximumf %9, %8 : vector<16x196xf32>
    %11 = vector.broadcast %cst_8 : f32 to vector<16x196xf32>
    %12 = arith.minimumf %11, %10 : vector<16x196xf32>
    %13 = arith.mulf %6, %12 : vector<16x196xf32>
    %cst_9 = arith.constant 0.166666672 : f32
    %14 = vector.broadcast %cst_9 : f32 to vector<16x196xf32>
    %15 = arith.mulf %13, %14 : vector<16x196xf32>
    %16 = vector.extract_strided_slice %15 {offsets = [0, 0], sizes = [16, 49], strides = [1, 1]} : vector<16x196xf32> to vector<16x49xf32>
    %17 = vector.extract_strided_slice %15 {offsets = [0, 49], sizes = [16, 49], strides = [1, 1]} : vector<16x196xf32> to vector<16x49xf32>
    %18 = arith.maximumf %16, %17 : vector<16x49xf32>
    %19 = vector.extract_strided_slice %15 {offsets = [0, 98], sizes = [16, 49], strides = [1, 1]} : vector<16x196xf32> to vector<16x49xf32>
    %20 = vector.extract_strided_slice %15 {offsets = [0, 147], sizes = [16, 49], strides = [1, 1]} : vector<16x196xf32> to vector<16x49xf32>
    %21 = arith.maximumf %19, %20 : vector<16x49xf32>
    %22 = arith.maximumf %18, %21 : vector<16x49xf32>
    %cst_10 = arith.constant 2.000000e+01 : f32
    %23 = vector.broadcast %cst_10 : f32 to vector<16x49xf32>
    %24 = arith.minimumf %22, %23 : vector<16x49xf32>
    %25 = math.exp %24 : vector<16x49xf32>
    %cst_11 = arith.constant 1.000000e+00 : f32
    %26 = vector.broadcast %cst_11 : f32 to vector<16x49xf32>
    %27 = arith.addf %26, %25 : vector<16x49xf32>
    %28 = arith.mulf %27, %27 : vector<16x49xf32>
    %cst_12 = arith.constant 1.000000e+00 : f32
    %29 = vector.broadcast %cst_12 : f32 to vector<16x49xf32>
    %30 = arith.subf %28, %29 : vector<16x49xf32>
    %31 = arith.mulf %22, %30 : vector<16x49xf32>
    %cst_13 = arith.constant 1.000000e+00 : f32
    %32 = vector.broadcast %cst_13 : f32 to vector<16x49xf32>
    %33 = arith.addf %28, %32 : vector<16x49xf32>
    %34 = tpu.reciprocal %33 {approx = true} : vector<16x49xf32> -> vector<16x49xf32>
    %35 = arith.mulf %31, %34 : vector<16x49xf32>
    %36 = arith.truncf %35 : vector<16x49xf32> to vector<16x49xbf16>
    %c0_14 = arith.constant 0 : index
    %c0_15 = arith.constant 0 : index
    %c0_16 = arith.constant 0 : index
    %37 = vector.load %arg4[%c0_14, %c0_15, %c0_16] : memref<1x16x49xbf16, #tpu.memory_space<vmem>>, vector<1x16x49xbf16>
    %38 = vector.shape_cast %37 : vector<1x16x49xbf16> to vector<16x49xbf16>
    %39 = vector.shape_cast %36 : vector<16x49xbf16> to vector<1x16x49xbf16>
    tpu.vector_store %arg4[%c0_14, %c0_15, %c0_16], %39 {strides = array<i32>} : memref<1x16x49xbf16, #tpu.memory_space<vmem>>, vector<1x16x49xbf16>,
    return
  }
  func.func @transform_0(%arg0: i32) -> (i32, i32, i32) {
    %c0_i32 = arith.constant 0 : i32
    %c0_i32_0 = arith.constant 0 : i32
    %c0_i32_1 = arith.constant 0 : i32
    return %arg0, %c0_i32, %c0_i32_0 : i32, i32, i32
  }
  func.func @transform_1(%arg0: i32) -> (i32, i32) {
    %c0_i32 = arith.constant 0 : i32
    %c0_i32_0 = arith.constant 0 : i32
    %c0_i32_1 = arith.constant 0 : i32
    return %c0_i32, %c0_i32_0 : i32, i32
  }
  func.func @transform_2(%arg0: i32) -> (i32, i32) {
    %c0_i32 = arith.constant 0 : i32
    %c0_i32_0 = arith.constant 0 : i32
    %c0_i32_1 = arith.constant 0 : i32
    return %c0_i32, %c0_i32_0 : i32, i32
  }
  func.func @transform_3(%arg0: i32) -> (i32, i32, i32) {
    %c0_i32 = arith.constant 0 : i32
    %c0_i32_0 = arith.constant 0 : i32
    %c0_i32_1 = arith.constant 0 : i32
    return %arg0, %c0_i32, %c0_i32_0 : i32, i32, i32
  }
}

</mosaic_0001>

<bundles_post_ra>
// kernel: model_forward.1
= control target key start
LH: loop header
LB: loop body
LE: loop exit
PB: predicated region body
PF: predicated region fallthrough
CT: control target
= control target key end

     0   :  { %s502_s12 = smov 0   ;;  %s532_s0 = inlined_call_operand.vmem [shape: bf16[2,27,196], index: 0, kind: input, shape index: {}]   ;;  %s533_s1 = inlined_call_operand.vmem [shape: bf16[16,27], index: 1, kind: input, shape index: {}]   ;;  %s534_s2 = inlined_call_operand.vmem [shape: f32[16,1], index: 2, kind: input, shape index: {}]   ;;  %s535_s3 = inlined_call_operand.vmem [shape: bf16[2,16,49], index: 3, kind: output, shape index: {}]  }
   0x1 LB: > { %s417_s13 = sadd.s32 4294967295, %s476_s12   ;;  %p421_p0 = scmp.ge.s32.totalorder %s476_s12, 1  ;;  %s476_s12 = sphi %s502_s12, %s13_s12  }
   0x2   : > { %p137_p1 = scmp.lt.s32.totalorder %s476_s12, 3 }
   0x4   : > { %p138_p2 = pnand %p421_p0, %p137_p1 }
   0x5   : > { %p161_p3 = scmp.lt.s32.totalorder (!%p138_p2), %s417_s13, 1  ;;  %vm217_vm0 = vcmask (!%p138_p2), 1044480   ;;  %v478_v0 = vmov (!%p138_p2), 0   ;;  %v178_v1 = vld [vmem:[%s534_s2] sm:$0xff] (!%p138_p2)  ;;  %vm218_vm1 = vcmask (!%p138_p2), 1045504   ;;  %v479_v2 = vmov (!%p138_p2), 65535  }
   0x6   : > { %141 = sbr.rel (%p138_p2) target bundleno = 526 (0x20e), region = 32  ;;  %259 = vmatprep.mubr.bf16.mxu0 (!%p138_p2), %v478_v0  ;;  %454 = vset.pattern.permute.xlu0 (!%p138_p2), %v478_v0  ;;  %v219_v3 = vsel (!%p138_p2), %vm217_vm0, 4294967295, %v479_v2  ;;  %v179_v4 = vld [vmem:[%s534_s2 + $0x8] sm:$0xff] (!%p138_p2)  ;;  %v461_v12 = vld [vmem:[%s533_s1] sm:$0xff] (!%p138_p2)   ;;  %vm213_vm2 = vcmask (!%p138_p2), 220160   ;;  %s480_s24 = smov (!%p138_p2), 79  }
   0x7   : > { %182 = vperm.xlu0 (!%p138_p2), %454, %v178_v1   ;;  %v220_v7 = vsel (!%p138_p2), %vm218_vm1, %v219_v3, 0  ;;  %s481_s25 = smov (!%p138_p2), 30   ;;  %vm324_vm3 = vcmask (!%p138_p2), 244736   ;;  %vm359_vm4 = vcmask (!%p138_p2), 396288  }
   0xb   : > { %187 = vperm.xlu0 (!%p138_p2), %454, %v179_v4  }
   0xd   : > { %s537_s13 = smov (!%p161_p3, %s417_s13), 1 }
   0xe   : > { %s438_s16 = sshll.u32 %s537_s13, 5  ;;  %s439_s26 = sshll.u32 %s537_s13, 3 }
   0xf   : > { %s165_s21 = scalar_lea.vmem %s532_s0, %s438_s16  ;;  %s170_s29 = scalar_lea.vmem %s535_s3, %s439_s26 }
  0x10   : > { %v455_v5 = vld [vmem:[%s165_s21 + $0x4] ss:$8 sps:$4 sm:$0xff]   ;;  %v457_v6 = vld [vmem:[%s165_s21] ss:$8 sps:$4 sm:$0xff]  }
  0x11   : > { %227 = vmatprep.subr.bf16.mxu0 %v455_v5  ;;  %v458_v8 = vld [vmem:[%s165_s21 + $0x14] ss:$8 sps:$4 sm:$0x3f]   ;;  %v460_v9 = vld [vmem:[%s165_s21 + $0x10] ss:$8 sps:$4 sm:$0x3f]  }
  0x12   : > { %228 = vmatpush1.bf16.msra.mxu0 %v457_v6  ;;  %v225_v10 = vand.u32 %v458_v8, %v220_v7  ;;  %v222_v11 = vand.u32 %v460_v9, %v220_v7 }
  0x14   : > { %229 = vmatprep.subr.bf16.mxu0 %v225_v10 }
  0x16   : > { %230 = vmatpush1.bf16.msra.mxu0 %v222_v11 }
  0x19   : > { %431 = vmatmul.mubr.msk.bf16.vlgmr.msra.gmra.mrb[0].mxu0 %vm213_vm2, %v461_v12 }
  0x86   : > { %v183_v13 = vpop.permute.xlu0 %182 }
  0x8a   : > { %v188_v15 = vpop.permute.xlu0 %187 }
  0xec   : > { %v261_v14 = vpop.f32.mrb[0].mxu0 }
  0xed   : > { %v262_v16 = vadd.f32 %v261_v14, %v183_v13  ;;  %v263_v17 = vpop.f32.mrb[1].mxu0 }
  0xee   : > { %v264_v18 = vadd.f32 %v263_v17, %v183_v13  ;;  %v265_v19 = vpop.f32.mrb[2].mxu0 }
  0xef   : > { %v270_v20 = vadd.f32 3.0, %v262_v16  ;;  %v266_v21 = vadd.f32 %v265_v19, %v188_v15  ;;  %v267_v22 = vpop.f32.mrb[3].mxu0 }
  0xf0   : > { %v271_v23 = vadd.f32 3.0, %v264_v18  ;;  %v268_v24 = vadd.f32 %v267_v22, %v188_v15 }
  0xf1   : > { %v274_v25 = vmax.f32 %v270_v20, 0.0  ;;  %v272_v26 = vadd.f32 3.0, %v266_v21 }
  0xf2   : > { %v275_v27 = vmax.f32 %v271_v23, 0.0  ;;  %v273_v28 = vadd.f32 3.0, %v268_v24 }
  0xf3   : > { %v278_v29 = vmin.f32 %v274_v25, 6.0  ;;  %v276_v31 = vmax.f32 %v272_v26, 0.0 }
  0xf4   : > { %v279_v30 = vmin.f32 %v275_v27, 6.0  ;;  %v277_v32 = vmax.f32 %v273_v28, 0.0 }
  0xf5   : > { %v282_v33 = vmul.f32 %v278_v29, %v262_v16  ;;  %v280_v37 = vmin.f32 %v276_v31, 6.0 }
  0xf6   : > { %v281_v34 = vmin.f32 %v277_v32, 6.0  ;;  %v283_v35 = vmul.f32 %v279_v30, %v264_v18 }
  0xf7   : > { %v286_v36 = vmul.f32 0.16666667, %v282_v33  ;;  %v284_v40 = vmul.f32 %v280_v37, %v266_v21 }
  0xf8   : > { %v285_v38 = vmul.f32 %v281_v34, %v268_v24  ;;  %v287_v39 = vmul.f32 0.16666667, %v283_v35 }
  0xf9   : > { %292 = vrot.lane.b32.xlu0 %v286_v36, %s480_s24  ;;  %v288_v42 = vmul.f32 0.16666667, %v284_v40 }
  0xfa   : > { %302 = vrot.lane.b32.xlu1 %v287_v39, %s480_s24  ;;  %v289_v41 = vmul.f32 0.16666667, %v285_v38 }
  0xfe   : > { %304 = vrot.lane.b32.xlu1 %v289_v41, %s480_s24 }
 0x102   : > { %294 = vrot.lane.b32.xlu1 %v288_v42, %s480_s24 }
 0x16b   : > { %v293_v49 = vpop.permute.xlu0 %292 }
 0x16c   : > { %v303_v43 = vpop.permute.xlu1 %302  ;;  %v298_v51 = vmax.f32 %v286_v36, %v293_v49 }
 0x16d   : > { %v308_v44 = vmax.f32 %v286_v36, %v303_v43  ;;  %v309_v45 = vmax.f32 %v287_v39, %v303_v43 }
 0x16f   : > { %318 = vrot.lane.b32.xlu1 %v309_v45, %s481_s25  ;;  %316 = vrot.lane.b32.xlu0 %v308_v44, %s481_s25 }
 0x170   : > { %v305_v46 = vpop.permute.xlu1 %304 }
 0x171   : > { %v310_v47 = vmax.f32 %v288_v42, %v305_v46  ;;  %v311_v48 = vmax.f32 %v289_v41, %v305_v46 }
 0x173   : > { %322 = vrot.lane.b32.xlu1 %v311_v48, %s481_s25  ;;  %320 = vrot.lane.b32.xlu0 %v310_v47, %s481_s25 }
 0x174   : > { %v295_v50 = vpop.permute.xlu1 %294 }
 0x175   : > { %v299_v56 = vmax.f32 %v288_v42, %v295_v50 }
 0x1e1   : > { %v319_v52 = vpop.permute.xlu1 %318  ;;  %v317_v53 = vpop.permute.xlu0 %316 }
 0x1e2   : > { %v325_v54 = vsel %vm324_vm3, %v317_v53, %v319_v52 }
 0x1e3   : > { %v329_v55 = vmax.f32 %v298_v51, %v325_v54 }
 0x1e5   : > { %v331_v57 = vmin.f32 %v329_v55, 20.0  ;;  %v323_v58 = vpop.permute.xlu1 %322  ;;  %v321_v59 = vpop.permute.xlu0 %320 }
 0x1e6   : > { %v326_v60 = vsel %vm324_vm3, %v321_v59, %v323_v58 }
 0x1e7   : > { %v333_v61 = vmul.f32 1.442695, %v331_v57  ;;  %v330_v62 = vmax.f32 %v299_v56, %v326_v60 }
 0x1e9   : > { %462 = vpow2.f32 %v333_v61  ;;  %v332_v63 = vmin.f32 %v330_v62, 20.0 }
 0x1eb   : > { %v335_v0 = vmul.f32 1.442695, %v332_v63 }
 0x1ed   : > { %464 = vpow2.f32 %v335_v0 }
 0x1f3   : > { %v463_v1 = vpop.eup %462 }
 0x1f4   : > { %v337_v2 = vadd.f32 1.0, %v463_v1 }
 0x1f6   : > { %v339_v3 = vmul.f32 %v337_v2, %v337_v2 }
 0x1f7   : > { %v465_v4 = vpop.eup %464 }
 0x1f8   : > { %v345_v5 = vadd.f32 1.0, %v339_v3  ;;  %v338_v6 = vadd.f32 1.0, %v465_v4  ;;  %v432_v9 = vadd.f32 -1.0, %v339_v3 }
 0x1fa   : > { %466 = vrcp.f32 %v345_v5  ;;  %v340_v7 = vmul.f32 %v338_v6, %v338_v6  ;;  %v343_v10 = vmul.f32 %v432_v9, %v329_v55 }
 0x1fc   : > { %v346_v8 = vadd.f32 1.0, %v340_v7  ;;  %v433_v11 = vadd.f32 -1.0, %v340_v7 }
 0x1fe   : > { %468 = vrcp.f32 %v346_v8  ;;  %v344_v15 = vmul.f32 %v433_v11, %v330_v62 }
 0x204   : > { %v467_v12 = vpop.eup %466 }
 0x205   : > { %v349_v13 = vmul.f32 %v467_v12, %v343_v10 }
 0x207   : > { %v440_v14 = vpack.c.bf16 %v349_v13, %v349_v13 }
 0x208   : > { %v469_v16 = vpop.eup %468 }
 0x209   : > { %360 = vst.msk [vmem:[%s170_s29] sm:$0xf] %vm359_vm4, %v440_v14  ;;  %v350_v17 = vmul.f32 %v469_v16, %v344_v15 }
 0x20b   : > { %v441_v18 = vpack.c.bf16 %v350_v17, %v350_v17 }
 0x20d   : > { %361 = vst.msk [vmem:[%s170_s29 + $0x4] sm:$0xf] %vm359_vm4, %v441_v18 }
 0x20e PF: > { %s13_s12 = sadd.s32 1, %s476_s12  }
 0x20f   : > { %p10_p4 = scmp.ge.s32.totalorder %s13_s12, 4  }
 0x211   :  { %12 = sbr.rel (!%p10_p4) target bundleno = 1 (0x1), region = 62 }

</bundles_post_ra>
